<compile_context>
chip_gen: v6e
topology: v6e:2x2x1
jax: 0.10.0
libtpu: 0.0.40
codegen_flags: <defaults>
</compile_context>

<pallas_src>
import functools

import jax
import jax.numpy as jnp
from jax import lax
from jax.experimental import pallas as pl
from jax.experimental.pallas import tpu as pltpu


def _global_max_attn_pool_kernel(w_ref, x_ref, o_ref, max_acc, attn_acc, *,
                                 hw_rem):
    # w_ref:    (1, 1, C)        -- 1x1 conv weight (un-replicated), x dtype
    # x_ref:    (TB, C, T)       -- one HW tile for TB batch elements, x dtype
    # o_ref:    (TB, 2, C)       -- row 0 = channel max, row 1 = attention sum
    # max_acc:  (TB, C) f32 scratch (running channel max)
    # attn_acc: (TB, C) f32 scratch (running attention sum)
    # hw_rem:   static int; nonzero => last HW tile has zero-padded lanes
    k = pl.program_id(1)
    num_k = pl.num_programs(1)
    tb, c, t = x_ref.shape

    @pl.when(k == 0)
    def _init():
        max_acc[...] = jnp.full(max_acc.shape, -jnp.inf, jnp.float32)
        attn_acc[...] = jnp.zeros(attn_acc.shape, jnp.float32)

    x = x_ref[...]                                   # (TB, C, T), input dtype
    w = jnp.broadcast_to(w_ref[...], (tb, 1, c))     # (TB, 1, C), input dtype

    # ---- global max branch (input dtype; mask only on the last tile) -----
    if hw_rem:  # static: zero padding exists only in the final HW tile
        @pl.when(k < num_k - 1)
        def _plain_max():
            tile_max = jnp.max(x, axis=-1)                       # (TB, C)
            max_acc[...] = jnp.maximum(max_acc[...],
                                       tile_max.astype(jnp.float32))

        @pl.when(k == num_k - 1)
        def _masked_max():
            lane = lax.broadcasted_iota(jnp.int32, x.shape, 2)
            xm = jnp.where(lane < hw_rem, x, -jnp.inf)
            tile_max = jnp.max(xm, axis=-1)                      # (TB, C)
            max_acc[...] = jnp.maximum(max_acc[...],
                                       tile_max.astype(jnp.float32))
    else:
        tile_max = jnp.max(x, axis=-1)                           # (TB, C)
        max_acc[...] = jnp.maximum(max_acc[...],
                                   tile_max.astype(jnp.float32))

    # ---- attention branch -------------------------------------------------
    # logits[b, 0, t] = sum_c w[b, 0, c] * x[b, c, t]  (contract C on MXU,
    # native-dtype inputs, f32 accumulation).
    logits = jnp.einsum("boc,bct->bot", w, x,
                        preferred_element_type=jnp.float32)      # (TB, 1, T)
    gate = jax.nn.sigmoid(logits)                                # (TB, 1, T) f32
    # attn[b, c] = sum_t gate[b, 0, t] * x[b, c, t]
    #   VPU multiply with gate broadcast over the C sublanes, then a lane
    #   reduce on the XLU -- no materialized transpose, no M=1 MXU matmul.
    #   Padded lanes / padded batch rows have x == 0 -> contribute nothing.
    tile_attn = jnp.sum(x * gate, axis=-1)                       # (TB, C) f32
    attn_acc[...] = attn_acc[...] + tile_attn

    @pl.when(k == num_k - 1)
    def _store():
        o_ref[:, 0:1, :] = max_acc[...][:, None, :].astype(o_ref.dtype)
        o_ref[:, 1:2, :] = attn_acc[...][:, None, :].astype(o_ref.dtype)


def _vmem_budget():
    """(per_input_buffer_bytes, vmem_limit_bytes), generation-aware."""
    per_buf, limit = 16 << 20, 48 << 20          # safe on v7x (64 MiB / TC)
    try:
        cap = int(pltpu.get_tpu_info().vmem_capacity_bytes)
        if cap >= (100 << 20):                   # v5e / v6e: 128 MiB VMEM
            per_buf, limit = 24 << 20, 80 << 20
    except Exception:
        pass                                     # unknown -> stay conservative
    return per_buf, limit


def global_max_attn_pool2d(x_nchw, conv_weight):
    """x_nchw: (N, C, H, W); conv_weight: (1, C, 1, 1), no bias.

    Returns (N, 2*C, 1, 1), matching GlobalMaxAttnPool2d.forward
    (channel order: [max channels | attn channels]).
    """
    n, c, h, w = x_nchw.shape
    hw = h * w
    itemsize = x_nchw.dtype.itemsize
    per_buf, vmem_limit = _vmem_budget()

    # ---- batch block: amortize per-step overhead, keep >=2 parallel steps ----
    tb_cap = 8
    if n >= 2:
        tb_cap = min(tb_cap, (n + 1) // 2)       # >=2 batch blocks (megacore)
    tb = 1
    for cand in (8, 4, 2, 1):
        if cand > tb_cap:
            continue
        if cand * c * 128 * itemsize > per_buf:  # minimal 128-lane tile must fit
            continue
        n_pad_cand = ((n + cand - 1) // cand) * cand
        if n % cand != 0 and (n_pad_cand - n) > max(0, n // 4):
            continue                             # avoid excessive batch padding
        tb = cand
        break
    n_pad = ((n + tb - 1) // tb) * tb

    # ---- HW tiling: largest 128-multiple tile under the VMEM budget ----
    hw_lane = ((hw + 127) // 128) * 128
    max_tile = max(128, (per_buf // (tb * c * itemsize)) // 128 * 128)
    hw_tile = min(hw_lane, max_tile)
    num_hw_tiles = -(-hw // hw_tile)
    hw_pad = num_hw_tiles * hw_tile
    hw_rem = hw % hw_tile                        # nonzero => last tile padded

    x_flat = x_nchw.reshape(n, c, hw)
    if hw_pad != hw or n_pad != n:
        # Zero padding: contributes 0 to attn (x==0); max branch masks the
        # padded lanes in-kernel; padded batch rows are sliced off below.
        x_flat = jnp.pad(x_flat, ((0, n_pad - n), (0, 0), (0, hw_pad - hw)))

    # Un-replicated 1x1 conv weight, cast to x dtype (keeps bf16 on the MXU).
    w2 = conv_weight.reshape(1, 1, c).astype(x_nchw.dtype)

    kernel = functools.partial(_global_max_attn_pool_kernel, hw_rem=hw_rem)

    out = pl.pallas_call(
        kernel,
        out_shape=jax.ShapeDtypeStruct((n_pad, 2, c), x_nchw.dtype),
        grid=(n_pad // tb, num_hw_tiles),
        in_specs=[
            pl.BlockSpec((1, 1, c), lambda b, k: (0, 0, 0)),         # weight
            pl.BlockSpec((tb, c, hw_tile), lambda b, k: (b, 0, k)),  # x tile
        ],
        out_specs=pl.BlockSpec((tb, 2, c), lambda b, k: (b, 0, 0)),
        scratch_shapes=[
            pltpu.VMEM((tb, c), jnp.float32),    # running channel max
            pltpu.VMEM((tb, c), jnp.float32),    # running attention sum
        ],
        compiler_params=pltpu.CompilerParams(
            dimension_semantics=("parallel", "arbitrary"),
            vmem_limit_bytes=vmem_limit,
        ),
        cost_estimate=pl.CostEstimate(
            flops=5 * n * c * hw,
            transcendentals=n * hw,
            bytes_accessed=(n * c * hw + n * 2 * c + c) * itemsize,
        ),
    )(w2, x_flat)

    # (N, 2, C) row-major reshape -> [max channels | attn channels] per batch.
    return out[:n].reshape(n, 2 * c, 1, 1)


def _reference(x_nchw, conv_weight):
    c = x_nchw.shape[1]
    mx = jnp.max(x_nchw, axis=(-2, -1), keepdims=True)
    logits = jnp.einsum("nchw,oc->nohw", x_nchw, conv_weight.reshape(1, c))
    gate = jax.nn.sigmoid(logits)
    attn = jnp.sum(x_nchw * gate, axis=(-2, -1), keepdims=True)
    return jnp.concatenate([mx, attn], axis=1)


if __name__ == "__main__":
    key = jax.random.PRNGKey(0)
    kx, kw = jax.random.split(key)

    N, C, H, W = 2, 4, 16, 16
    x = jax.random.normal(kx, (N, C, H, W), dtype=jnp.float32)
    # Deterministic 1x1 conv weight, shape (out=1, in=C, 1, 1), no bias.
    conv_w = (jax.random.normal(kw, (1, C, 1, 1), dtype=jnp.float32)
              * (1.0 / jnp.sqrt(C)))

    out = global_max_attn_pool2d(x, conv_w)
    out = jax.block_until_ready(out)

    ref = _reference(x, conv_w)
    assert out.shape == (N, 2 * C, 1, 1), out.shape
    assert jnp.allclose(out, ref, atol=1e-4, rtol=1e-4), (
        float(jnp.max(jnp.abs(out - ref)))
    )
    print("KERNEL_OK")
</pallas_src>

<mosaic_0001>
module attributes {stable_mosaic.version = 11 : i64} {
  func.func @_global_max_attn_pool_kernel(%arg0: i32, %arg1: i32, %arg2: memref<1x1x4xf32, #tpu.memory_space<vmem>>, %arg3: memref<1x4x256xf32, #tpu.memory_space<vmem>>, %arg4: memref<1x2x4xf32, #tpu.memory_space<vmem>>, %arg5: memref<1x4xf32, #tpu.memory_space<vmem>>, %arg6: memref<1x4xf32, #tpu.memory_space<vmem>>) attributes {dimension_semantics = [#tpu.dimension_semantics<parallel>, #tpu.dimension_semantics<arbitrary>], iteration_bounds = array<i64: 2, 1>, scalar_prefetch = 0 : i64, scratch_operands = 2 : i64, tpu.core_type = #tpu.core_type<tc>, window_params = [{pipeline_mode = #tpu.pipeline_mode<synchronous>, transform_indices = @transform_0, window_bounds = array<i64: 1, 1, 4>}, {transform_indices = @transform_1, window_bounds = array<i64: 1, 4, 256>}, {transform_indices = @transform_2, window_bounds = array<i64: 1, 2, 4>}]} {
    %c0_i32 = arith.constant 0 : i32
    %0 = arith.cmpi eq, %arg1, %c0_i32 : i32
    %1 = arith.extui %0 : i1 to i32
    %c0_i32_0 = arith.constant 0 : i32
    %2 = arith.cmpi ne, %1, %c0_i32_0 : i32
    scf.if %2 {
      %cst_19 = arith.constant 0xFF800000 : f32
      %24 = vector.broadcast %cst_19 : f32 to vector<1x4xf32>
      %c0_20 = arith.constant 0 : index
      %c0_21 = arith.constant 0 : index
      %25 = vector.load %arg5[%c0_20, %c0_21] : memref<1x4xf32, #tpu.memory_space<vmem>>, vector<1x4xf32>
      tpu.vector_store %arg5[%c0_20, %c0_21], %24 {strides = array<i32>} : memref<1x4xf32, #tpu.memory_space<vmem>>, vector<1x4xf32>,
      %cst_22 = arith.constant 0.000000e+00 : f32
      %26 = vector.broadcast %cst_22 : f32 to vector<1x4xf32>
      %c0_23 = arith.constant 0 : index
      %c0_24 = arith.constant 0 : index
      %27 = vector.load %arg6[%c0_23, %c0_24] : memref<1x4xf32, #tpu.memory_space<vmem>>, vector<1x4xf32>
      tpu.vector_store %arg6[%c0_23, %c0_24], %26 {strides = array<i32>} : memref<1x4xf32, #tpu.memory_space<vmem>>, vector<1x4xf32>,
    } else {
    }
    %c0 = arith.constant 0 : index
    %c0_1 = arith.constant 0 : index
    %c0_2 = arith.constant 0 : index
    %3 = vector.load %arg3[%c0, %c0_1, %c0_2] : memref<1x4x256xf32, #tpu.memory_space<vmem>>, vector<1x4x256xf32>
    %c0_3 = arith.constant 0 : index
    %c0_4 = arith.constant 0 : index
    %c0_5 = arith.constant 0 : index
    %4 = vector.load %arg2[%c0_3, %c0_4, %c0_5] : memref<1x1x4xf32, #tpu.memory_space<vmem>>, vector<1x1x4xf32>
    %cst = arith.constant dense<0xFF800000> : vector<1x4xf32>
    %5 = vector.multi_reduction <maximumf>, %3, %cst [2] : vector<1x4x256xf32> to vector<1x4xf32>
    %c0_6 = arith.constant 0 : index
    %c0_7 = arith.constant 0 : index
    %6 = vector.load %arg5[%c0_6, %c0_7] : memref<1x4xf32, #tpu.memory_space<vmem>>, vector<1x4xf32>
    %7 = arith.maximumf %6, %5 : vector<1x4xf32>
    %c0_8 = arith.constant 0 : index
    %c0_9 = arith.constant 0 : index
    %8 = vector.load %arg5[%c0_8, %c0_9] : memref<1x4xf32, #tpu.memory_space<vmem>>, vector<1x4xf32>
    tpu.vector_store %arg5[%c0_8, %c0_9], %7 {strides = array<i32>} : memref<1x4xf32, #tpu.memory_space<vmem>>, vector<1x4xf32>,
    "tpu.trace_start"() <{level = 10 : i32, message = "boc,bct->bot"}> : () -> ()
    %cst_10 = arith.constant dense<0.000000e+00> : vector<1x1x256xf32>
    %9 = tpu.matmul %4, %3, %cst_10 {dimension_numbers = #tpu.dot_dimension_numbers<[2], [1], [1], [2], [0, 0, 0, 1, 1, 2], [0], [0]>} : vector<1x1x4xf32>, vector<1x4x256xf32>, vector<1x1x256xf32> -> vector<1x1x256xf32>
    "tpu.trace_stop"() : () -> ()
    %10 = arith.negf %9 : vector<1x1x256xf32>
    %11 = math.exp %10 : vector<1x1x256xf32>
    %cst_11 = arith.constant 1.000000e+00 : f32
    %12 = vector.broadcast %cst_11 : f32 to vector<1x1x256xf32>
    %13 = arith.addf %12, %11 : vector<1x1x256xf32>
    %14 = arith.divf %12, %13 : vector<1x1x256xf32>
    %15 = vector.broadcast %14 : vector<1x1x256xf32> to vector<1x4x256xf32>
    %16 = arith.mulf %3, %15 : vector<1x4x256xf32>
    %cst_12 = arith.constant dense<0.000000e+00> : vector<1x4xf32>
    %17 = vector.multi_reduction <add>, %16, %cst_12 [2] : vector<1x4x256xf32> to vector<1x4xf32>
    %c0_13 = arith.constant 0 : index
    %c0_14 = arith.constant 0 : index
    %18 = vector.load %arg6[%c0_13, %c0_14] : memref<1x4xf32, #tpu.memory_space<vmem>>, vector<1x4xf32>
    %19 = arith.addf %18, %17 : vector<1x4xf32>
    %c0_15 = arith.constant 0 : index
    %c0_16 = arith.constant 0 : index
    %20 = vector.load %arg6[%c0_15, %c0_16] : memref<1x4xf32, #tpu.memory_space<vmem>>, vector<1x4xf32>
    tpu.vector_store %arg6[%c0_15, %c0_16], %19 {strides = array<i32>} : memref<1x4xf32, #tpu.memory_space<vmem>>, vector<1x4xf32>,
    %c0_i32_17 = arith.constant 0 : i32
    %21 = arith.cmpi eq, %arg1, %c0_i32_17 : i32
    %22 = arith.extui %21 : i1 to i32
    %c0_i32_18 = arith.constant 0 : i32
    %23 = arith.cmpi ne, %22, %c0_i32_18 : i32
    scf.if %23 {
      %c0_19 = arith.constant 0 : index
      %c0_20 = arith.constant 0 : index
      %24 = vector.load %arg5[%c0_19, %c0_20] : memref<1x4xf32, #tpu.memory_space<vmem>>, vector<1x4xf32>
      %25 = vector.shape_cast %24 : vector<1x4xf32> to vector<1x1x4xf32>
      %c0_21 = arith.constant 0 : index
      %c0_22 = arith.constant 0 : index
      %c0_23 = arith.constant 0 : index
      %26 = vector.load %arg4[%c0_21, %c0_22, %c0_23] : memref<1x2x4xf32, #tpu.memory_space<vmem>>, vector<1x1x4xf32>
      tpu.vector_store %arg4[%c0_21, %c0_22, %c0_23], %25 {strides = array<i32>} : memref<1x2x4xf32, #tpu.memory_space<vmem>>, vector<1x1x4xf32>,
      %c0_24 = arith.constant 0 : index
      %c0_25 = arith.constant 0 : index
      %27 = vector.load %arg6[%c0_24, %c0_25] : memref<1x4xf32, #tpu.memory_space<vmem>>, vector<1x4xf32>
      %28 = vector.shape_cast %27 : vector<1x4xf32> to vector<1x1x4xf32>
      %c0_26 = arith.constant 0 : index
      %c1 = arith.constant 1 : index
      %c0_27 = arith.constant 0 : index
      %29 = vector.load %arg4[%c0_26, %c1, %c0_27] : memref<1x2x4xf32, #tpu.memory_space<vmem>>, vector<1x1x4xf32>
      tpu.vector_store %arg4[%c0_26, %c1, %c0_27], %28 {strides = array<i32>} : memref<1x2x4xf32, #tpu.memory_space<vmem>>, vector<1x1x4xf32>,
    } else {
    }
    return
  }
  func.func @transform_0(%arg0: i32, %arg1: i32) -> (i32, i32, i32) {
    %c0_i32 = arith.constant 0 : i32
    %c0_i32_0 = arith.constant 0 : i32
    %c0_i32_1 = arith.constant 0 : i32
    %c0_i32_2 = arith.constant 0 : i32
    return %c0_i32, %c0_i32_0, %c0_i32_1 : i32, i32, i32
  }
  func.func @transform_1(%arg0: i32, %arg1: i32) -> (i32, i32, i32) {
    %c0_i32 = arith.constant 0 : i32
    %c0_i32_0 = arith.constant 0 : i32
    return %arg0, %c0_i32, %arg1 : i32, i32, i32
  }
  func.func @transform_2(%arg0: i32, %arg1: i32) -> (i32, i32, i32) {
    %c0_i32 = arith.constant 0 : i32
    %c0_i32_0 = arith.constant 0 : i32
    %c0_i32_1 = arith.constant 0 : i32
    return %arg0, %c0_i32, %c0_i32_0 : i32, i32, i32
  }
}

</mosaic_0001>

<bundles_post_ra>
// kernel: tpu_custom_call.1
= control target key start
LH: loop header
LB: loop body
LE: loop exit
PB: predicated region body
PF: predicated region fallthrough
CT: control target
= control target key end

     0   :  { %7 = vsyncpa [#allocation5], 0  ;;  %s1021_s0 = inlined_call_operand.hbm [shape: f32[1,1,4], index: 0, kind: input, shape index: {}]   ;;  %s1022_s1 = inlined_call_operand.hbm [shape: f32[2,4,256], index: 1, kind: input, shape index: {}]   ;;  %s1023_s2 = inlined_call_operand.hbm [shape: f32[2,2,4], index: 2, kind: output, shape index: {}]  }
   0x1   :  { %8 = vsyncpa [#allocation8], 0 }
   0x2   :  { %10 = vsyncpa [#allocation8 + $0x1], 0 }
   0x3   :  { %11 = vsyncpa [#allocation6], 0 }
   0x4   :  { %13 = vsyncpa [#allocation6 + $0x1], 0  ;;  %s841_s9 = smov 0   ;;  %s843_s10 = smov 0  }
   0x5   :  { %s845_s11 = smov 0   ;;  %s847_s12 = smov 0  }
   0x6   :  { %s849_s13 = smov 0   ;;  %s851_s14 = smov 0  }
   0x7 LB: > { %s569_s15 = sadd.s32 4294967295, %s817_s14   ;;  %s570_s16 = sadd.s32 4294967294, %s817_s14   ;;  %s817_s14 = sphi %s851_s14, %s19_s14   ;;  %s813_s13 = sphi %s849_s13, %s1040_s13   ;;  %s809_s12 = sphi %s847_s12, %s1039_s12   ;;  %s805_s11 = sphi %s845_s11, %s1038_s11   ;;  %s801_s10 = sphi %s843_s10, %s1037_s10   ;;  %s797_s9 = sphi %s841_s9, %s1036_s9  }
   0x8   : > { %p74_p0 = scmp.ne.s32.totalorder %s801_s10, %s797_s9  ;;  %p875_p1 = scmp.eq.s32.totalorder %s569_s15, 0 }
   0x9   : > { %p879_p2 = scmp.eq.s32.totalorder %s569_s15, 1  ;;  %p104_p3 = scmp.eq.s32.totalorder %s570_s16, 1 }
   0xa   : > { %p885_p4 = por %p875_p1, %p74_p0  ;;  %p571_p5 = scmp.ge.s32.totalorder %s817_s14, 1 }
   0xb   : > { %p890_p6 = por %p104_p3, %p74_p0  ;;  %p111_p7 = scmp.lt.s32.totalorder %s817_s14, 3 }
   0xc   : > { %s1027_s19 = scalar_select %p885_p4, 1, 0 }
   0xd   : > { %s1028_s20 = scalar_select %p890_p6, 1, 0 }
   0xe   : > { %p895_p8 = pnand %p571_p5, %p111_p7  ;;  %s819_s22 = smov [#allocation4]  }
   0xf   : > { %s124_s23 = sshll.u32 %s819_s22, 4  ;;  %s31_s25 = sadd.s32 1, %s813_s13  ;;  %s125_s23 = int_to_ptr.vmem [resolvable:$true] %s124_s23 }
  0x10   : > { %p599_p10 = pneg %p895_p8  ;;  %s61_s26 = sadd.s32 1, %s805_s11 }
  0x11   : > { %p33_p12 = scmp.ge.s32.totalorder %s31_s25, 2  ;;  %s690_s27 = scalar_lea.vmem %s125_s23, 16 }
  0x12   : > { %p904_p11 = pnand %p599_p10, %p875_p1  ;;  %p691_p0 = scmp.ne.s32.totalorder %s125_s23, %s690_s27 }
  0x13   : > { %s697_s28 = scalar_lea.vmem %s125_s23, 32  ;;  %p698_p7 = scmp.lt.s32.totalorder %s125_s23, %s125_s23 }
  0x14   : > { %p681_p13 = pneg %p904_p11  ;;  %p699_p9 = scmp.lt.s32.totalorder %s697_s28, %s690_s27 }
  0x16   : > { %p693_p3 = pnand %p691_p0, %p681_p13  ;;  %p700_p6 = por %p699_p9, %p698_p7 }
  0x18   : > { %p694_p5 = pneg %p693_p3 }
  0x1a   : > { %p701_p4 = pnand %p700_p6, %p694_p5 }
  0x1c   : > { %704 = shalt.err (!%p701_p4)
}
  0x1d   : > { %602 = dma.hbm_to_vmem [thread:$0]  (!%p904_p11), %s1021_s0, 16, %s125_s23, [#allocation5]  }
  0x1e   : > { %s1042_s25 = smov (%p33_p12, %s31_s25), 0  ;;  %p68_p6 = scmp.ne.s32.totalorder %s805_s11, %s801_s10 }
  0x1f   : > { %p69_p4 = scmp.eq.s32.totalorder %s817_s14, 0  ;;  %s56_s3 = ssub.s32 %s813_s13, %s1042_s25 }
  0x20   : > { %p612_p9 = scmp.lt.s32.totalorder %s817_s14, 2  ;;  %p59_p10 = scmp.eq.s32.totalorder %s56_s3, 0 }
  0x21   : > { %p70_p13 = por %p69_p4, %p68_p6  ;;  %p927_p0 = por %p879_p2, %p68_p6 }
  0x22   : > { %s135_s5 = sand.u32 1, %s805_s11   ;;  %s590_s8 = sshll.u32 %s813_s13, 7 }
  0x23   : > { %s933_s6 = scalar_select %p59_p10, %s805_s11, %s61_s26  }
  0x24   : > { %s574_s7 = sshll.u32 %s135_s5, 3  ;;  %s147_s22 = scalar_lea.hbm %s1022_s1, %s590_s8 }
  0x25   : > { %s139_s23 = scalar_lea.vmem [#allocation7], %s574_s7  ;;  %p939_p11 = pnand %p612_p9, %p70_p13 }
  0x26   : > { %s149_s24 = sshll.u32 %s139_s23, 4  ;;  %s136_s18 = scalar_lea.sflag [#allocation8], %s135_s5  ;;  %s150_s24 = int_to_ptr.vmem [resolvable:$true] %s149_s24 }
  0x27   : > { %p707_p2 = pneg %p939_p11  ;;  %s718_s28 = scalar_lea.vmem %s150_s24, 128 }
  0x28   : > { %p719_p12 = scmp.ne.s32.totalorder %s150_s24, %s718_s28  ;;  %s820_s26 = smov [#allocation7]  }
  0x29   : > { %s723_s29 = sshll.u32 %s820_s26, 4  ;;  %s724_s29 = int_to_ptr.vmem [resolvable:$false] %s723_s29 }
  0x2a   : > { %p721_p3 = pnand %p719_p12, %p707_p2  ;;  %s725_s30 = scalar_lea.vmem %s724_s29, 256 }
  0x2b   : > { %p726_p7 = scmp.lt.s32.totalorder %s150_s24, %s724_s29  ;;  %p727_p6 = scmp.lt.s32.totalorder %s725_s30, %s718_s28 }
  0x2c   : > { %p722_p5 = pneg %p721_p3 }
  0x2d   : > { %p728_p4 = por %p727_p6, %p726_p7 }
  0x2f   : > { %p729_p10 = pnand %p728_p4, %p722_p5 }
  0x31   : > { %732 = shalt.err (!%p729_p10)
}
  0x32   : > { %606 = dma.hbm_to_vmem [thread:$0]  (!%p939_p11), %s147_s22, 128, %s150_s24, %s136_s18  }
  0x33   : > { %158 = sbr.rel (%p895_p8) target bundleno = 605 (0x25d), region = 28 }
  0x38   : > { %784 = dma.done.wait (%p875_p1), [#allocation5], 16  }
  0x39   : > { %786 = vsyncadd (%p875_p1), [#allocation5], 4294967280  ;;  %s954_s3 = sand.u32 1, %s801_s10   ;;  %p1033_p9 = scmp.ne.s32.totalorder %s1027_s19, 0 }
  0x3a   : > { %s579_s5 = sshll.u32 %s954_s3, 3  ;;  %s165_s7 = scalar_lea.sflag [#allocation8], %s954_s3 }
  0x3b   : > { %s168_s8 = scalar_lea.vmem [#allocation7], %s579_s5 }
  0x3c   : > { %788 = dma.done.wait (%p1033_p9), %s165_s7, 128  }
  0x3d   : > { %790 = vsyncadd (%p1033_p9), %s165_s7, 4294967168  ;;  %vm194_vm0 = vcmask 24576   ;;  %v821_v0 = vmov 0.0   ;;  %v197_v1 = vld [vmem:[%s168_s8] sm:$0xff]  ;;  %vm202_vm1 = vcmask 1043456   ;;  %vm277_vm2 = vcmask 31744  }
  0x3e   : > { %196 = vst.msk [vmem:[#allocation3] sm:$0x1] %vm194_vm0, %v821_v0  ;;  %349 = vmatprep.mubr.f32.mxu0 %v821_v0  ;;  %v200_v2 = vcombine.high %v197_v1, %v197_v1  ;;  %v198_v3 = vld [vmem:[#allocation4] sm:$0x1]  ;;  %v203_v4 = vsel %vm202_vm1, %v197_v1, -inf  ;;  %v210_v15 = vlaneseq  ;;  %v823_v46 = vmov 0  }
  0x3f   : > { %v822_v27 = vmov 1966171168   ;;  %668 = vset.pattern.permute.xlu1 %v823_v46  ;;  %669 = vset.pattern.permute.xlu0 %v823_v46  ;;  %v824_v47 = vmov -inf   ;;  %s580_s17 = sshll.u32 %s954_s3, 1  ;;  %s587_s21 = sshll.u32 %s809_s12, 5 }
  0x40   : > { %581 = vmatprep.subr.msk.mxu0 %vm202_vm1, %v200_v2  ;;  %v204_v5 = vsel %vm202_vm1, %v200_v2, -inf  ;;  %v211_v16 = vshrl.u32 %v210_v15, 7  ;;  %v229_v28 = vunpack.c.l.s4 %v822_v27  ;;  %195 = vst.msk [vmem:[#allocation2] sm:$0x1] %vm194_vm0, %v824_v47  ;;  %v254_v48 = vand.u32 127, %v210_v15  ;;  %s188_s19 = scalar_lea.vmem [#allocation9], %s580_s17  ;;  %s978_s23 = scalar_lea.hbm %s1023_s2, %s587_s21 }
  0x41   : > { %582 = vmatpush1.msk.msra.mxu0 %vm202_vm1, %v197_v1  ;;  %v205_v6 = vmax.f32 %v203_v4, %v204_v5  ;;  %s476_s15 = sshll.u32 %s188_s19, 4  ;;  %s463_s24 = scalar_lea.sflag [#allocation6], %s954_s3  ;;  %s477_s15 = int_to_ptr.vmem [resolvable:$true] %s476_s15 }
  0x42   : > { %583 = vmatmul.mubr.msk.f32.vlgmr.msra.gmra.mxu0 %vm277_vm2, %v198_v3  ;;  %v212_v17 = vsub.s32 0, %v211_v16  ;;  %v216_v30 = vsub.s32 1, %v211_v16  ;;  %v220_v31 = vsub.s32 2, %v211_v16  ;;  %v224_v32 = vsub.s32 3, %v211_v16  ;;  %s733_s27 = scalar_lea.vmem %s477_s15, 32  ;;  %s825_s18 = smov [#allocation9]  }
  0x43   : > { %206 = vmax.xlane.f32.xlu0 %v205_v6  ;;  %v230_v34 = vunpack.c.0.s8 %v229_v28  ;;  %v257_v49 = vsub.s32 %v254_v48, %v211_v16  ;;  %p734_p1 = scmp.ne.s32.totalorder %s477_s15, %s733_s27  ;;  %s737_s28 = sshll.u32 %s825_s18, 4  ;;  %s738_s28 = int_to_ptr.vmem [resolvable:$false] %s737_s28 }
  0x44   : > { %s739_s12 = scalar_lea.vmem %s738_s28, 64  ;;  %p740_p11 = scmp.lt.s32.totalorder %s477_s15, %s738_s28 }
  0x45   : > { %v233_v39 = vsub.s32 %v230_v34, %v211_v16  ;;  %p735_p8 = pnand %p734_p1, %p927_p0  ;;  %p741_p2 = scmp.lt.s32.totalorder %s739_s12, %s733_s27 }
  0x47   : > { %v208_v62 = vld [vmem:[#allocation2] sm:$0x1]  ;;  %p736_p13 = pneg %p735_p8  ;;  %p742_p12 = por %p741_p2, %p740_p11 }
  0x49   : > { %p743_p3 = pnand %p742_p12, %p736_p13 }
  0xcc   : > { %v207_v33 = vpop.xlane.xlu0 %206 }
  0xcd   : > { %v213_v35 = vrot.slane %v207_v33, %v212_v17  ;;  %v217_v36 = vrot.slane %v207_v33, %v216_v30  ;;  %v221_v37 = vrot.slane %v207_v33, %v220_v31  ;;  %v225_v38 = vrot.slane %v207_v33, %v224_v32 }
  0xcf   : > { %v226_v40 = vcombine.low %v213_v35, %v217_v36  ;;  %v227_v41 = vcombine.low %v221_v37, %v225_v38 }
  0xd1   : > { %v234_v42 = vrot.slane %v226_v40, %v233_v39  ;;  %v241_v43 = vrot.slane %v227_v41, %v233_v39 }
  0xd3   : > { %v242_v44 = vcombine.low %v234_v42, %v241_v43 }
  0xd5   : > { %v249_v45 = vrot.slane %v242_v44, %v233_v39 }
  0xd7   : > { %251 = vperm.xlu1 %668, %v249_v45  }
 0x102   : > { %v351_v7 = vpop.f32.mrf.mxu0 }
 0x103   : > { %v584_v8 = vmul.f32 -1.442695, %v351_v7  ;;  %v389_v7 = vld [vmem:[#allocation3] sm:$0x1] }
 0x104   : > { %v353_v9 = vpop.f32.mrf.mxu0 }
 0x105   : > { %671 = vpow2.f32 %v584_v8  ;;  %v585_v10 = vmul.f32 -1.442695, %v353_v9 }
 0x107   : > { %673 = vpow2.f32 %v585_v10 }
 0x112   : > { %v672_v11 = vpop.eup %671 }
 0x113   : > { %v362_v12 = vadd.f32 1.0, %v672_v11 }
 0x114   : > { %v674_v13 = vpop.eup %673 }
 0x115   : > { %675 = vrcp.f32 %v362_v12  ;;  %v363_v14 = vadd.f32 1.0, %v674_v13 }
 0x117   : > { %677 = vrcp.f32 %v363_v14 }
 0x122   : > { %v676_v18 = vpop.eup %675 }
 0x123   : > { %v371_v20 = vrot.slane %v676_v18, %v212_v17 }
 0x124   : > { %v678_v19 = vpop.eup %677 }
 0x125   : > { %v375_v21 = vrot.slane %v678_v19, %v212_v17 }
 0x127   : > { %v378_v22 = vcombine.low %v371_v20, %v375_v21 }
 0x129   : > { %v380_v23 = vmul.f32 %v378_v22, %v197_v1 }
 0x12b   : > { %v382_v24 = vcombine.high %v380_v23, %v380_v23  ;;  %v384_v25 = vsel %vm202_vm1, %v380_v23, 0.0 }
 0x12d   : > { %v385_v26 = vsel %vm202_vm1, %v382_v24, 0.0 }
 0x12e   : > { %v386_v29 = vadd.f32 %v385_v26, %v384_v25 }
 0x130   : > { %387 = vadd.xlane.f32.xlu0 %v386_v29 }
 0x152   : > { %v252_v55 = vpop.permute.xlu1 %251 }
 0x153   : > { %v258_v58 = vrot.slane %v252_v55, %v257_v49 }
 0x155   : > { %v265_v61 = vrot.slane %v258_v58, %v233_v39 }
 0x157   : > { %v272_v0 = vrot.slane %v265_v61, %v233_v39 }
 0x159   : > { %v274_v2 = vmax.f32 %v208_v62, %v272_v0 }
 0x15b   : > { %276 = vst.msk [vmem:[#allocation2] sm:$0x1] %vm194_vm0, %v274_v2 }
 0x162   : > { %v458_v3 = vld [vmem:[#allocation2] sm:$0x1] }
 0x163   : > { %459 = vst.msk [vmem:[%s188_s19] sm:$0x1] %vm194_vm0, %v458_v3 }
 0x1b9   : > { %v388_v50 = vpop.xlane.xlu0 %387 }
 0x1ba   : > { %v394_v51 = vrot.slane %v388_v50, %v212_v17  ;;  %v398_v52 = vrot.slane %v388_v50, %v216_v30  ;;  %v402_v53 = vrot.slane %v388_v50, %v220_v31  ;;  %v406_v54 = vrot.slane %v388_v50, %v224_v32 }
 0x1bc   : > { %v407_v56 = vcombine.low %v394_v51, %v398_v52  ;;  %v408_v57 = vcombine.low %v402_v53, %v406_v54 }
 0x1be   : > { %v415_v59 = vrot.slane %v407_v56, %v233_v39  ;;  %v422_v60 = vrot.slane %v408_v57, %v233_v39 }
 0x1c0   : > { %v423_v63 = vcombine.low %v415_v59, %v422_v60 }
 0x1c2   : > { %v430_v1 = vrot.slane %v423_v63, %v233_v39 }
 0x1c4   : > { %432 = vperm.xlu1 %668, %v430_v1  }
 0x23f   : > { %v433_v4 = vpop.permute.xlu1 %432 }
 0x240   : > { %v437_v5 = vrot.slane %v433_v4, %v257_v49 }
 0x242   : > { %v444_v6 = vrot.slane %v437_v5, %v233_v39 }
 0x244   : > { %v451_v8 = vrot.slane %v444_v6, %v233_v39 }
 0x246   : > { %v453_v9 = vadd.f32 %v451_v8, %v389_v7 }
 0x248   : > { %454 = vst.msk [vmem:[#allocation3] sm:$0x1] %vm194_vm0, %v453_v9 }
 0x24f   : > { %v460_v10 = vld [vmem:[#allocation3] sm:$0x1] }
 0x250   : > { %461 = vst.msk [vmem:[%s188_s19 + $0x1] sm:$0x1] %vm194_vm0, %v460_v10 }
 0x251   : > { %746 = shalt.err (!%p743_p3)
}
 0x252   : > { %s747_s26 = scalar_lea.hbm %s978_s23, 32  ;;  %s751_s3 = scalar_lea.hbm %s1023_s2, 64 }
 0x253   : > { %p748_p5 = scmp.ne.s32.totalorder %s978_s23, %s747_s26  ;;  %p752_p4 = scmp.lt.s32.totalorder %s978_s23, %s1023_s2 }
 0x254   : > { %p753_p10 = scmp.lt.s32.totalorder %s751_s3, %s747_s26 }
 0x255   : > { %p749_p7 = pnand %p748_p5, %p927_p0 }
 0x256   : > { %p754_p9 = por %p753_p10, %p752_p4 }
 0x257   : > { %p750_p6 = pneg %p749_p7 }
 0x259   : > { %p755_p1 = pnand %p754_p9, %p750_p6 }
 0x25b   : > { %758 = shalt.err (!%p755_p1)
}
 0x25c   : > { %597 = dma.vmem_to_hbm [thread:$0]  (%p927_p0), %s477_s15, 32, %s978_s23, %s463_s24  }
 0x25d PF: > { %s488_s8 = sand.u32 1, %s797_s9   ;;  %p1034_p8 = scmp.ne.s32.totalorder %s1028_s20, 0 }
 0x25e   : > { %p1035_p13 = scmp.ge.s32.totalorder %s817_s14, 2  ;;  %s489_s17 = scalar_lea.sflag [#allocation6], %s488_s8 }
 0x260   : > { %p608_p11 = pnand %p1035_p13, %p1034_p8 }
 0x262   : > { %p609_p2 = pneg %p608_p11 }
 0x264   : > { %792 = dma.done.wait (%p609_p2), %s489_s17, 32  }
 0x265   : > { %794 = vsyncadd (%p609_p2), %s489_s17, 4294967264  ;;  %s19_s14 = sadd.s32 1, %s817_s14   ;;  %s1036_s9 = smov %s801_s10 }
 0x266   : > { %p16_p12 = scmp.ge.s32.totalorder %s19_s14, 4   ;;  %s1037_s10 = smov %s805_s11 }
 0x267   : > { %s1038_s11 = smov %s933_s6  ;;  %s1039_s12 = smov %s813_s13 }
 0x268   : > { %s1040_s13 = smov %s1042_s25  ;;  %18 = sbr.rel (!%p16_p12) target bundleno = 7 (0x7), region = 86 }
 0x26d   :  { %494 = vsyncpa [#allocation5], 1 }
 0x26e   :  { %496 = vsyncpa [#allocation5 + $0x1], 1 }
 0x26f   :  { %497 = vsyncpa [#allocation8], 1 }
 0x270   :  { %499 = vsyncpa [#allocation8 + $0x1], 1 }
 0x271   :  { %500 = vsyncpa [#allocation6], 1 }
 0x272   :  { %502 = vsyncpa [#allocation6 + $0x1], 1 }

</bundles_post_ra>
